<compile_context>
chip_gen: v7x
topology: tpu7x:2x2x1
jax: 0.10.0
libtpu: 0.0.40
codegen_flags: <defaults>
</compile_context>

<pallas_src>
import jax
import jax.numpy as jnp
from jax.experimental import pallas as pl
from jax.experimental.pallas import tpu as pltpu


def mlp_kernel(xt_ref, w1_ref, b1_ref, w2_ref, b2_ref, ot_ref):
    # xt_ref: (Din, TB)   w1_ref: (H, Din)   b1_ref: (H, 1)
    # w2_ref: (Dout, H)   b2_ref: (Dout, 1)  ot_ref: (Dout, TB)
    # h^T = relu(W1 @ x^T + b1): f32 MXU accumulation, f32 VPU elementwise.
    ht = jnp.dot(w1_ref[...], xt_ref[...], preferred_element_type=jnp.float32)
    ht = jnp.maximum(ht + b1_ref[...], 0.0)
    # y^T = W2 @ h^T + b2; cast only at the dot boundary (no-op for f32 weights).
    yt = jnp.dot(w2_ref[...], ht.astype(w2_ref.dtype),
                 preferred_element_type=jnp.float32) + b2_ref[...]
    ot_ref[...] = yt.astype(ot_ref.dtype)


def _round_up(n, m):
    return ((n + m - 1) // m) * m


def _choose_batch_tile(batch, tb):
    """Lane-tile for the batch axis: multiple of 128, big enough to amortize the
    ~0.35 us per-grid-step overhead, clamped to the (rounded) batch, and split
    into >= 2 steps when the batch allows so v7x megacore has balanced work."""
    b128 = _round_up(max(batch, 1), 128)
    tb_eff = max(128, min(_round_up(tb, 128), b128))
    if b128 // tb_eff < 2 and b128 >= 256:
        tb_eff = _round_up(pl.cdiv(b128, 2), 128)
    return tb_eff


def mlp_forward_fb(xt, w1, b1, w2, b2, *, tb=64 * 1024):
    """Feature-major entry point (zero wrapper-side data movement).

    xt: (Din, B). Returns (Dout, B) = W2 @ relu(W1 @ xt + b1) + b2.
    Use this variant when the surrounding model keeps activations in
    (feature, batch) layout.
    """
    din, batch = xt.shape
    hdim = w1.shape[0]
    dout = w2.shape[0]

    # Biases as column vectors: the bias add is a single lane-broadcast per tile.
    b1c = b1.reshape(-1, 1).astype(jnp.float32)   # (H, 1)
    b2c = b2.reshape(-1, 1).astype(jnp.float32)   # (Dout, 1)

    tb_eff = _choose_batch_tile(batch, tb)
    grid = (pl.cdiv(batch, tb_eff),)              # ragged tail -> Pallas edge block

    # Live VMEM per step (f32, lane dim = tb_eff, sublane dims padded to 8):
    #   x^T in : 2 bufs * 8*tb*4 = 64*tb      y^T out: 2 bufs * 8*tb*4 = 64*tb
    #   h^T + elementwise temps  ~= 96*tb     weights/biases: negligible
    vmem_needed = 224 * tb_eff + (1 << 20)
    vmem_limit = int(min(max(vmem_needed, 32 << 20), 64 << 20))

    itemsize = jnp.dtype(xt.dtype).itemsize
    cost = pl.CostEstimate(
        flops=2 * batch * (din * hdim + hdim * dout),
        transcendentals=0,
        bytes_accessed=itemsize * batch * (din + dout)
        + 4 * (hdim * din + hdim + dout * hdim + dout),
    )

    return pl.pallas_call(
        mlp_kernel,
        out_shape=jax.ShapeDtypeStruct((dout, batch), xt.dtype),
        grid_spec=pltpu.PrefetchScalarGridSpec(
            num_scalar_prefetch=0,
            grid=grid,
            in_specs=[
                pl.BlockSpec((din, tb_eff), lambda i: (0, i)),   # x^T: tiled over batch
                pl.BlockSpec((hdim, din), lambda i: (0, 0)),     # W1: VMEM-resident
                pl.BlockSpec((hdim, 1), lambda i: (0, 0)),       # b1: VMEM-resident
                pl.BlockSpec((dout, hdim), lambda i: (0, 0)),    # W2: VMEM-resident
                pl.BlockSpec((dout, 1), lambda i: (0, 0)),       # b2: VMEM-resident
            ],
            out_specs=pl.BlockSpec((dout, tb_eff), lambda i: (0, i)),
        ),
        compiler_params=pltpu.CompilerParams(
            dimension_semantics=("parallel",),   # shard batch tiles across TCs on v7x
            vmem_limit_bytes=vmem_limit,
        ),
        cost_estimate=cost,
    )(xt, w1, b1c, w2, b2c)


def mlp_forward(x, w1, b1, w2, b2, *, tb=64 * 1024):
    """PyTorch-layout wrapper: x (B, Din) -> (B, Dout), matching nn.Linear weights.

    The two transposes here are the only wrapper-side copies and exist solely to
    match the (batch, feature) interface; prefer mlp_forward_fb to avoid them.
    Wrap in jax.jit together with the surrounding model in real use.
    """
    return mlp_forward_fb(x.T, w1, b1, w2, b2, tb=tb).T


if __name__ == "__main__":
    key = jax.random.PRNGKey(0)
    kx, k1, kb1, k2, kb2 = jax.random.split(key, 5)

    B, DIN, H, DOUT = 2, 4, 8, 2
    x = jax.random.normal(kx, (B, DIN), dtype=jnp.float32)

    # Deterministic parameters (shapes as PyTorch nn.Linear stores them).
    w1 = jax.random.normal(k1, (H, DIN), dtype=jnp.float32) * 0.1
    b1 = jax.random.normal(kb1, (H,), dtype=jnp.float32) * 0.1
    w2 = jax.random.normal(k2, (DOUT, H), dtype=jnp.float32) * 0.1
    b2 = jax.random.normal(kb2, (DOUT,), dtype=jnp.float32) * 0.1

    fwd = jax.jit(mlp_forward)
    y = fwd(x, w1, b1, w2, b2)
    jax.block_until_ready(y)

    # Pure-JAX reference check (PyTorch semantics: out(relu(hidden(x)))).
    ref = jnp.maximum(x @ w1.T + b1, 0.0) @ w2.T + b2
    assert y.shape == (B, DOUT)
    assert jnp.allclose(y, ref, atol=1e-5, rtol=1e-5)

    # Feature-major (zero-copy) entry point must agree as well.
    y_fb = jax.jit(mlp_forward_fb)(x.T, w1, b1, w2, b2)
    jax.block_until_ready(y_fb)
    assert jnp.allclose(y_fb.T, ref, atol=1e-5, rtol=1e-5)

    print("KERNEL_OK")
</pallas_src>

<mosaic_0001>
module attributes {stable_mosaic.version = 11 : i64} {
  func.func @mlp_kernel(%arg0: i32, %arg1: memref<4x128xf32, #tpu.memory_space<vmem>>, %arg2: memref<8x4xf32, #tpu.memory_space<vmem>>, %arg3: memref<8x1xf32, #tpu.memory_space<vmem>>, %arg4: memref<2x8xf32, #tpu.memory_space<vmem>>, %arg5: memref<2x1xf32, #tpu.memory_space<vmem>>, %arg6: memref<2x128xf32, #tpu.memory_space<vmem>>) attributes {dimension_semantics = [#tpu.dimension_semantics<parallel>], iteration_bounds = array<i64: 1>, scalar_prefetch = 0 : i64, scratch_operands = 0 : i64, tpu.core_type = #tpu.core_type<tc>, window_params = [{transform_indices = @transform_0, window_bounds = array<i64: 4, 128>}, {pipeline_mode = #tpu.pipeline_mode<synchronous>, transform_indices = @transform_1, window_bounds = array<i64: 8, 4>}, {pipeline_mode = #tpu.pipeline_mode<synchronous>, transform_indices = @transform_2, window_bounds = array<i64: 8, 1>}, {pipeline_mode = #tpu.pipeline_mode<synchronous>, transform_indices = @transform_3, window_bounds = array<i64: 2, 8>}, {pipeline_mode = #tpu.pipeline_mode<synchronous>, transform_indices = @transform_4, window_bounds = array<i64: 2, 1>}, {transform_indices = @transform_5, window_bounds = array<i64: 2, 128>}]} {
    %c0 = arith.constant 0 : index
    %c0_0 = arith.constant 0 : index
    %0 = vector.load %arg2[%c0, %c0_0] : memref<8x4xf32, #tpu.memory_space<vmem>>, vector<8x4xf32>
    %c0_1 = arith.constant 0 : index
    %c0_2 = arith.constant 0 : index
    %1 = vector.load %arg1[%c0_1, %c0_2] : memref<4x128xf32, #tpu.memory_space<vmem>>, vector<4x128xf32>
    %cst = arith.constant dense<0.000000e+00> : vector<8x128xf32>
    %2 = tpu.matmul %0, %1, %cst {dimension_numbers = #tpu.dot_dimension_numbers<[1], [0], [0], [1], [0, 0, 1, 1], [], []>} : vector<8x4xf32>, vector<4x128xf32>, vector<8x128xf32> -> vector<8x128xf32>
    %c0_3 = arith.constant 0 : index
    %c0_4 = arith.constant 0 : index
    %3 = vector.load %arg3[%c0_3, %c0_4] : memref<8x1xf32, #tpu.memory_space<vmem>>, vector<8x1xf32>
    %4 = vector.broadcast %3 : vector<8x1xf32> to vector<8x128xf32>
    %5 = arith.addf %2, %4 : vector<8x128xf32>
    %cst_5 = arith.constant 0.000000e+00 : f32
    %6 = vector.broadcast %cst_5 : f32 to vector<8x128xf32>
    %7 = arith.maximumf %5, %6 : vector<8x128xf32>
    %c0_6 = arith.constant 0 : index
    %c0_7 = arith.constant 0 : index
    %8 = vector.load %arg4[%c0_6, %c0_7] : memref<2x8xf32, #tpu.memory_space<vmem>>, vector<2x8xf32>
    %cst_8 = arith.constant dense<0.000000e+00> : vector<2x128xf32>
    %9 = tpu.matmul %8, %7, %cst_8 {dimension_numbers = #tpu.dot_dimension_numbers<[1], [0], [0], [1], [0, 0, 1, 1], [], []>} : vector<2x8xf32>, vector<8x128xf32>, vector<2x128xf32> -> vector<2x128xf32>
    %c0_9 = arith.constant 0 : index
    %c0_10 = arith.constant 0 : index
    %10 = vector.load %arg5[%c0_9, %c0_10] : memref<2x1xf32, #tpu.memory_space<vmem>>, vector<2x1xf32>
    %11 = vector.broadcast %10 : vector<2x1xf32> to vector<2x128xf32>
    %12 = arith.addf %9, %11 : vector<2x128xf32>
    %c0_11 = arith.constant 0 : index
    %c0_12 = arith.constant 0 : index
    %13 = vector.load %arg6[%c0_11, %c0_12] : memref<2x128xf32, #tpu.memory_space<vmem>>, vector<2x128xf32>
    tpu.vector_store %arg6[%c0_11, %c0_12], %12 {strides = array<i32>} : memref<2x128xf32, #tpu.memory_space<vmem>>, vector<2x128xf32>,
    return
  }
  func.func @transform_0(%arg0: i32) -> (i32, i32) {
    %c0_i32 = arith.constant 0 : i32
    %c0_i32_0 = arith.constant 0 : i32
    return %c0_i32, %arg0 : i32, i32
  }
  func.func @transform_1(%arg0: i32) -> (i32, i32) {
    %c0_i32 = arith.constant 0 : i32
    %c0_i32_0 = arith.constant 0 : i32
    %c0_i32_1 = arith.constant 0 : i32
    return %c0_i32, %c0_i32_0 : i32, i32
  }
  func.func @transform_2(%arg0: i32) -> (i32, i32) {
    %c0_i32 = arith.constant 0 : i32
    %c0_i32_0 = arith.constant 0 : i32
    %c0_i32_1 = arith.constant 0 : i32
    return %c0_i32, %c0_i32_0 : i32, i32
  }
  func.func @transform_3(%arg0: i32) -> (i32, i32) {
    %c0_i32 = arith.constant 0 : i32
    %c0_i32_0 = arith.constant 0 : i32
    %c0_i32_1 = arith.constant 0 : i32
    return %c0_i32, %c0_i32_0 : i32, i32
  }
  func.func @transform_4(%arg0: i32) -> (i32, i32) {
    %c0_i32 = arith.constant 0 : i32
    %c0_i32_0 = arith.constant 0 : i32
    %c0_i32_1 = arith.constant 0 : i32
    return %c0_i32, %c0_i32_0 : i32, i32
  }
  func.func @transform_5(%arg0: i32) -> (i32, i32) {
    %c0_i32 = arith.constant 0 : i32
    %c0_i32_0 = arith.constant 0 : i32
    return %c0_i32, %arg0 : i32, i32
  }
}

</mosaic_0001>

<bundles_post_ra>
// kernel: mlp_forward.1
= control target key start
LH: loop header
LB: loop body
LE: loop exit
PB: predicated region body
PF: predicated region fallthrough
CT: control target
= control target key end

     0   :  { %vm32_vm0 = vcmask 1043456   ;;  %vm28_vm1 = vcmask 31744   ;;  %v214_v0 = vmov 0.0   ;;  %vm215_vm2 = vmmov 0   ;;  %s265_s0 = inlined_call_operand.vmem [shape: f32[4,2], index: 0, kind: input, shape index: {}]   ;;  %s266_s1 = inlined_call_operand.vmem [shape: f32[8,4], index: 1, kind: input, shape index: {}]   ;;  %s267_s2 = inlined_call_operand.vmem [shape: f32[8,1], index: 2, kind: input, shape index: {}]   ;;  %s268_s4 = inlined_call_operand.vmem [shape: f32[2,1], index: 4, kind: input, shape index: {}]   ;;  %s269_s3 = inlined_call_operand.vmem [shape: f32[2,8], index: 3, kind: input, shape index: {}]   ;;  %s270_s5 = inlined_call_operand.vmem [shape: f32[2,2], index: 5, kind: output, shape index: {}]  }
   0x1   :  { %200 = vmatprep.subr.mxu0 %v214_v0  ;;  %v21_v1 = vld [vmem:[%s265_s0] sm:$0xf]  ;;  %202 = vmatprep.mubr.msk.f32.mxu0 %vm215_vm2, %v214_v0  ;;  %v216_v4 = vmov 0   ;;  %vm114_vm3 = vcmask 64512  }
   0x2   :  { %v20_v2 = vld [vmem:[%s266_s1] sm:$0xff]  ;;  %201 = vmatpush3.msk.msra.mxu0 %vm32_vm0, %v21_v1  ;;  %213 = vset.pattern.permute.xlu0 %v216_v4 }
   0x3   :  { %v22_v3 = vld [vmem:[%s267_s2] sm:$0xff]  ;;  %203 = vmatmul.mubr.msk.f32.vlgmr.msra.gmra.mrb[0].mxu0 %vm28_vm1, %v20_v2  ;;  %205 = vmatprep.subr.mxu1 %v214_v0 }
   0x4   :  { %25 = vperm.xlu0 %213, %v22_v3   ;;  %v108_v5 = vld [vmem:[%s268_s4] sm:$0x3]  ;;  %207 = vmatprep.mubr.msk.f32.mxu1 %vm215_vm2, %v214_v0 }
   0x5   :  { %v107_v11 = vld [vmem:[%s269_s3] sm:$0x3] }
   0x8   :  { %111 = vperm.xlu0 %213, %v108_v5  }
  0x83   :  { %v26_v6 = vpop.permute.xlu0 %25 }
  0x87   :  { %v112_v12 = vpop.permute.xlu0 %111 }
  0xd6   :  { %v102_v7 = vpop.f32.mrb[0].mxu0 }
  0xd7   :  { %v103_v8 = vadd.f32 %v102_v7, %v26_v6  ;;  %v204_v9 = vpop.f32.mrb[1].mxu0 }
  0xd9   :  { %v106_v10 = vmax.f32 %v103_v8, 0.0 }
  0xdb   :  { %206 = vmatpush3.msra.mxu1 %v106_v10 }
  0xdc   :  { %208 = vmatmul.mubr.msk.f32.vlgmr.msra.gmra.mrb[0].mxu1 %vm114_vm3, %v107_v11 }
 0x1af   :  { %v184_v13 = vpop.f32.mrb[0].mxu1 }
 0x1b0   :  { %v185_v14 = vadd.f32 %v184_v13, %v112_v12  ;;  %v209_v15 = vpop.f32.mrb[1].mxu1 }
 0x1b2   :  { %188 = vst [vmem:[%s270_s5] sm:$0x3] %v185_v14 }

</bundles_post_ra>
